<compile_context>
chip_gen: v7x
topology: tpu7x:2x2x1
jax: 0.10.0
libtpu: 0.0.40
codegen_flags: <defaults>
</compile_context>

<pallas_src>
import math

import numpy as np
import jax
import jax.numpy as jnp
from jax import lax
from jax.experimental import pallas as pl
from jax.experimental.pallas import tpu as pltpu

NUM_SPHERICAL = 3   # L  (num_spherical)
NUM_RADIAL = 4      # K  (num_radial), <= 64 as asserted in the torch module
CUTOFF = 8.0
LANE = 128
MAX_TE = 2048       # edges (lanes) per grid step; sweep 1024-8192 for very large graphs
SMALL_A = 1.0       # below this argument, use the Taylor series for j_l (cancellation-free)


# --------------------------------------------------------------------------------------
# Host-side setup: replicates DimeNet's bessel_basis() zeros / normalizers with numpy only.
# --------------------------------------------------------------------------------------
def _spherical_jn_np(l, x):
    """Spherical Bessel j_l via upward recurrence (float64, host side)."""
    x = np.asarray(x, dtype=np.float64)
    j0 = np.sin(x) / x
    if l == 0:
        return j0
    j1 = np.sin(x) / x**2 - np.cos(x) / x
    if l == 1:
        return j1
    jm2, jm1 = j0, j1
    jl = j1
    for ll in range(2, l + 1):
        jl = (2 * ll - 1) / x * jm1 - jm2
        jm2, jm1 = jm1, jl
    return jl


def _bisect(f, a, b, iters=200):
    fa = f(a)
    for _ in range(iters):
        m = 0.5 * (a + b)
        fm = f(m)
        if fa * fm <= 0.0:
            b = m
        else:
            a, fa = m, fm
    return 0.5 * (a + b)


def _jn_zeros(n, k):
    """First k positive zeros of j_l for l = 0..n-1 (same interlacing scheme as DimeNet)."""
    zerosj = np.zeros((n, k), dtype=np.float64)
    zerosj[0] = np.arange(1, k + 1) * np.pi
    points = np.arange(1, k + n) * np.pi
    racines = np.zeros(k + n - 1, dtype=np.float64)
    for i in range(1, n):
        for j in range(k + n - 1 - i):
            racines[j] = _bisect(lambda r, i=i: _spherical_jn_np(i, r), points[j], points[j + 1])
        points = racines.copy()
        zerosj[i, :k] = racines[:k]
    return zerosj


def make_basis_constants(num_spherical, num_radial):
    zeros = _jn_zeros(num_spherical, num_radial)                     # (L, K)
    norms = np.zeros_like(zeros)
    for l in range(num_spherical):
        for n in range(num_radial):
            norms[l, n] = 1.0 / math.sqrt(0.5 * _spherical_jn_np(l + 1, zeros[l, n]) ** 2)
    return zeros.astype(np.float32), norms.astype(np.float32)


def _series_coeffs(num_spherical):
    """Taylor coefficients of j_l(a)/a^l = c0 + c1 a^2 + c2 a^4 + c3 a^6 (float64)."""
    c = np.zeros((num_spherical, 4), dtype=np.float64)
    for l in range(num_spherical):
        dfact = 1.0
        for m in range(1, 2 * l + 2, 2):
            dfact *= m                               # (2l+1)!!
        c0 = 1.0 / dfact
        c1 = -c0 / (2.0 * (2 * l + 3))
        c2 = c0 / (8.0 * (2 * l + 3) * (2 * l + 5))
        c3 = -c0 / (48.0 * (2 * l + 3) * (2 * l + 5) * (2 * l + 7))
        c[l] = (c0, c1, c2, c3)
    return c


# --------------------------------------------------------------------------------------
# Pallas kernel + wrapper (factory so the L, K constants are closed over)
# --------------------------------------------------------------------------------------
def make_angle_emb_forward(num_spherical=NUM_SPHERICAL, num_radial=NUM_RADIAL, cutoff=CUTOFF):
    L, K = num_spherical, num_radial
    zeros_np, norms_np = make_basis_constants(L, K)

    # Fold the zero-m spherical-harmonic coefficient sqrt((2l+1)/(4*pi)) into the per-row scale.
    y_coef = np.sqrt((2.0 * np.arange(L, dtype=np.float64) + 1.0) / (4.0 * math.pi))
    scale_np = (norms_np.astype(np.float64) * y_coef[:, None]).astype(np.float32)

    # Per-row constants (row = l*K + n):  zero, scale, [1/zero, c0, c1, c2, c3]
    zeros64 = zeros_np.astype(np.float64)
    ser = _series_coeffs(L)                                        # (L, 4)
    coef_np = np.zeros((L * K, 5), dtype=np.float64)
    coef_np[:, 0] = (1.0 / zeros64).reshape(L * K)                 # 1/z  (so 1/a = (1/z)*(1/x))
    coef_np[:, 1:5] = np.repeat(ser, K, axis=0)                    # series coeffs per row
    z_flat = jnp.asarray(zeros_np.reshape(L * K, 1))               # (L*K, 1) f32, grid-invariant
    scale_flat = jnp.asarray(scale_np.reshape(L * K, 1))           # (L*K, 1) f32, grid-invariant
    coef_flat = jnp.asarray(coef_np.astype(np.float32))            # (L*K, 5) f32, grid-invariant
    inv_cutoff = float(1.0 / cutoff)

    def kernel(z_ref, s_ref, coef_ref, dist_ref, angle_ref, out_ref):
        te = out_ref.shape[1]
        x = dist_ref[...] * inv_cutoff          # (1, TE)   dist / cutoff
        c = jnp.cos(angle_ref[...])             # (1, TE)

        # Legendre P_l(cos theta), each (1, TE)  (Y_l^0 coefficient already folded into s_ref)
        p = []
        p_lm2 = p_lm1 = None
        for l in range(L):
            if l == 0:
                p_l = jnp.ones_like(c)
            elif l == 1:
                p_l = c
            else:
                p_l = ((2 * l - 1) * c * p_lm1 - (l - 1) * p_lm2) * (1.0 / l)
            p.append(p_l)
            p_lm2, p_lm1 = p_lm1, p_l

        invz = coef_ref[:, 0:1]                 # (L*K, 1)
        c0 = coef_ref[:, 1:2]
        c1 = coef_ref[:, 2:3]
        c2 = coef_ref[:, 3:4]
        c3 = coef_ref[:, 4:5]

        # Dense spherical-Bessel evaluation: one (L*K, TE) array, one sin / cos each.
        a = z_ref[...] * x                      # (L*K, TE), lane-dense
        sa = jnp.sin(a)
        ca = jnp.cos(a)
        inv_x = 1.0 / x                         # (1, TE): single exact reciprocal per lane
        inv_a = invz * inv_x                    # (L*K, TE): 1/a = (1/z)*(1/x), ~2 ulp

        # Closed-form j_0..j_{L-1} (stable j_1 form; accurate for a >= SMALL_A).
        j_levels = []
        for l in range(L):
            if l == 0:
                jl = sa * inv_a
            elif l == 1:
                jl = (sa - a * ca) * (inv_a * inv_a)
            else:
                jl = (2 * l - 1) * inv_a * j_levels[l - 1] - j_levels[l - 2]
            j_levels.append(jl)

        # Per-row (row = l*K + n) selection of the order l with cheap VPU selects.
        row = lax.broadcasted_iota(jnp.int32, (L * K, te), 0)
        j_closed = j_levels[L - 1]
        p_all = jnp.broadcast_to(p[L - 1], (L * K, te))
        for l in range(L - 2, -1, -1):
            mask = row < (l + 1) * K
            j_closed = jnp.where(mask, j_levels[l], j_closed)
            p_all = jnp.where(mask, p[l], p_all)

        # a^l per row (leading factor of the small-argument series).
        lead = jnp.ones_like(a)
        pw = jnp.ones_like(a)
        for l in range(1, L):
            pw = pw * a
            lead = jnp.where(row >= l * K, pw, lead)

        # 4-term Taylor series (cancellation-free) for small arguments.
        a2 = a * a
        j_series = lead * (c0 + a2 * (c1 + a2 * (c2 + a2 * c3)))

        j_all = jnp.where(a < SMALL_A, j_series, j_closed)

        out_ref[...] = s_ref[...] * j_all * p_all

    def forward(dist, angle):
        """dist, angle: (E,) float32 -> (E, L*K) float32, column index = l*K + n."""
        E = dist.shape[0]
        e128 = pl.cdiv(E, LANE) * LANE
        # Largest lane-aligned tile up to MAX_TE, but keep >= 2 grid steps when E allows
        # so the "parallel" axis can be split across v7x's two TensorCores.
        te = min(MAX_TE, max(LANE, ((e128 // 2) // LANE) * LANE))
        n_steps = pl.cdiv(e128, te)
        E_pad = n_steps * te
        pad = E_pad - E
        # Pad with dist = 1.0 / angle = 1.0 so padded lanes avoid the 1/x singularity.
        dist_p = jnp.pad(dist.astype(jnp.float32), (0, pad), constant_values=1.0).reshape(1, E_pad)
        angle_p = jnp.pad(angle.astype(jnp.float32), (0, pad), constant_values=1.0).reshape(1, E_pad)

        out_t = pl.pallas_call(
            kernel,
            out_shape=jax.ShapeDtypeStruct((L * K, E_pad), jnp.float32),
            grid_spec=pltpu.PrefetchScalarGridSpec(
                num_scalar_prefetch=0,
                grid=(n_steps,),
                in_specs=[
                    pl.BlockSpec((L * K, 1), lambda i: (0, 0)),   # Bessel zeros       (grid-invariant)
                    pl.BlockSpec((L * K, 1), lambda i: (0, 0)),   # norm * Y_l^0       (grid-invariant)
                    pl.BlockSpec((L * K, 5), lambda i: (0, 0)),   # 1/z + series coefs (grid-invariant)
                    pl.BlockSpec((1, te), lambda i: (0, i)),      # dist lane-block
                    pl.BlockSpec((1, te), lambda i: (0, i)),      # angle lane-block
                ],
                out_specs=pl.BlockSpec((L * K, te), lambda i: (0, i)),
            ),
            compiler_params=pltpu.CompilerParams(dimension_semantics=("parallel",)),
        )(z_flat, scale_flat, coef_flat, dist_p, angle_p)

        return out_t[:, :E].T   # (E, L*K) — transpose back in XLA (layout plumbing only)

    return jax.jit(forward), zeros_np, norms_np


# --------------------------------------------------------------------------------------
# Pure-numpy reference (same math, float64) for a correctness check
# --------------------------------------------------------------------------------------
def reference_angle_emb(dist, angle, zeros, norms):
    L, K = NUM_SPHERICAL, NUM_RADIAL
    x = dist.astype(np.float64) / CUTOFF
    rbf = np.zeros((dist.shape[0], L, K), dtype=np.float64)
    for l in range(L):
        for n in range(K):
            rbf[:, l, n] = norms[l, n] * _spherical_jn_np(l, zeros[l, n] * x)
    c = np.cos(angle.astype(np.float64))
    sbf = np.zeros((dist.shape[0], L), dtype=np.float64)
    p_lm2 = p_lm1 = None
    for l in range(L):
        if l == 0:
            p_l = np.ones_like(c)
        elif l == 1:
            p_l = c
        else:
            p_l = ((2 * l - 1) * c * p_lm1 - (l - 1) * p_lm2) / l
        sbf[:, l] = math.sqrt((2 * l + 1) / (4.0 * math.pi)) * p_l
        p_lm2, p_lm1 = p_lm1, p_l
    out = rbf * sbf[:, :, None]
    return out.reshape(dist.shape[0], L * K).astype(np.float32)


if __name__ == "__main__":
    key = jax.random.PRNGKey(0)
    k1, k2 = jax.random.split(key)
    E = 300  # number of edges (angles)
    dist = jax.random.uniform(k1, (E,), minval=0.5, maxval=CUTOFF, dtype=jnp.float32)
    angle = jax.random.uniform(k2, (E,), minval=0.0, maxval=math.pi, dtype=jnp.float32)

    forward, zeros_np, norms_np = make_angle_emb_forward(NUM_SPHERICAL, NUM_RADIAL, CUTOFF)

    out = forward(dist, angle)
    out = jax.block_until_ready(out)

    assert out.shape == (E, NUM_SPHERICAL * NUM_RADIAL)
    ref = reference_angle_emb(np.asarray(dist), np.asarray(angle), zeros_np, norms_np)
    # f32 kernel vs f64 reference; the series/stable-recurrence split keeps errors at a few
    # f32 ulps of the output, comfortably inside these tolerances.
    np.testing.assert_allclose(np.asarray(out), ref, rtol=5e-4, atol=2e-4)

    print("KERNEL_OK")
</pallas_src>

<mosaic_0001>
module attributes {stable_mosaic.version = 11 : i64} {
  func.func @kernel(%arg0: i32, %arg1: memref<12x1xf32, #tpu.memory_space<vmem>>, %arg2: memref<12x1xf32, #tpu.memory_space<vmem>>, %arg3: memref<12x5xf32, #tpu.memory_space<vmem>>, %arg4: memref<1x128xf32, #tpu.memory_space<vmem>>, %arg5: memref<1x128xf32, #tpu.memory_space<vmem>>, %arg6: memref<12x128xf32, #tpu.memory_space<vmem>>) attributes {dimension_semantics = [#tpu.dimension_semantics<parallel>], iteration_bounds = array<i64: 3>, scalar_prefetch = 0 : i64, scratch_operands = 0 : i64, tpu.core_type = #tpu.core_type<tc>, window_params = [{pipeline_mode = #tpu.pipeline_mode<synchronous>, transform_indices = @transform_0, window_bounds = array<i64: 12, 1>}, {pipeline_mode = #tpu.pipeline_mode<synchronous>, transform_indices = @transform_1, window_bounds = array<i64: 12, 1>}, {pipeline_mode = #tpu.pipeline_mode<synchronous>, transform_indices = @transform_2, window_bounds = array<i64: 12, 5>}, {transform_indices = @transform_3, window_bounds = array<i64: 1, 128>}, {transform_indices = @transform_4, window_bounds = array<i64: 1, 128>}, {transform_indices = @transform_5, window_bounds = array<i64: 12, 128>}]} {
    %c0 = arith.constant 0 : index
    %c0_0 = arith.constant 0 : index
    %0 = vector.load %arg4[%c0, %c0_0] : memref<1x128xf32, #tpu.memory_space<vmem>>, vector<1x128xf32>
    %cst = arith.constant 1.250000e-01 : f32
    %1 = vector.broadcast %cst : f32 to vector<1x128xf32>
    %2 = arith.mulf %0, %1 : vector<1x128xf32>
    %c0_1 = arith.constant 0 : index
    %c0_2 = arith.constant 0 : index
    %3 = vector.load %arg5[%c0_1, %c0_2] : memref<1x128xf32, #tpu.memory_space<vmem>>, vector<1x128xf32>
    %4 = math.cos %3 : vector<1x128xf32>
    %cst_3 = arith.constant 1.000000e+00 : f32
    %5 = vector.broadcast %cst_3 : f32 to vector<1x128xf32>
    %cst_4 = arith.constant 3.000000e+00 : f32
    %6 = vector.broadcast %cst_4 : f32 to vector<1x128xf32>
    %7 = arith.mulf %6, %4 : vector<1x128xf32>
    %8 = arith.mulf %7, %4 : vector<1x128xf32>
    %cst_5 = arith.constant 1.000000e+00 : f32
    %9 = vector.broadcast %cst_5 : f32 to vector<1x128xf32>
    %10 = arith.mulf %9, %5 : vector<1x128xf32>
    %11 = arith.subf %8, %10 : vector<1x128xf32>
    %cst_6 = arith.constant 5.000000e-01 : f32
    %12 = vector.broadcast %cst_6 : f32 to vector<1x128xf32>
    %13 = arith.mulf %11, %12 : vector<1x128xf32>
    %c0_7 = arith.constant 0 : index
    %c0_8 = arith.constant 0 : index
    %14 = vector.load %arg3[%c0_7, %c0_8] : memref<12x5xf32, #tpu.memory_space<vmem>>, vector<12x1xf32>
    %c0_9 = arith.constant 0 : index
    %c1 = arith.constant 1 : index
    %15 = vector.load %arg3[%c0_9, %c1] : memref<12x5xf32, #tpu.memory_space<vmem>>, vector<12x1xf32>
    %c0_10 = arith.constant 0 : index
    %c2 = arith.constant 2 : index
    %16 = vector.load %arg3[%c0_10, %c2] : memref<12x5xf32, #tpu.memory_space<vmem>>, vector<12x1xf32>
    %c0_11 = arith.constant 0 : index
    %c3 = arith.constant 3 : index
    %17 = vector.load %arg3[%c0_11, %c3] : memref<12x5xf32, #tpu.memory_space<vmem>>, vector<12x1xf32>
    %c0_12 = arith.constant 0 : index
    %c4 = arith.constant 4 : index
    %18 = vector.load %arg3[%c0_12, %c4] : memref<12x5xf32, #tpu.memory_space<vmem>>, vector<12x1xf32>
    %c0_13 = arith.constant 0 : index
    %c0_14 = arith.constant 0 : index
    %19 = vector.load %arg1[%c0_13, %c0_14] : memref<12x1xf32, #tpu.memory_space<vmem>>, vector<12x1xf32>
    %20 = vector.broadcast %19 : vector<12x1xf32> to vector<12x128xf32>
    %21 = vector.broadcast %2 : vector<1x128xf32> to vector<12x128xf32>
    %22 = arith.mulf %20, %21 : vector<12x128xf32>
    %23 = math.sin %22 : vector<12x128xf32>
    %24 = math.cos %22 : vector<12x128xf32>
    %cst_15 = arith.constant 1.000000e+00 : f32
    %25 = vector.broadcast %cst_15 : f32 to vector<1x128xf32>
    %26 = arith.divf %25, %2 : vector<1x128xf32>
    %27 = vector.broadcast %14 : vector<12x1xf32> to vector<12x128xf32>
    %28 = vector.broadcast %26 : vector<1x128xf32> to vector<12x128xf32>
    %29 = arith.mulf %27, %28 : vector<12x128xf32>
    %30 = arith.mulf %23, %29 : vector<12x128xf32>
    %31 = arith.mulf %22, %24 : vector<12x128xf32>
    %32 = arith.subf %23, %31 : vector<12x128xf32>
    %33 = arith.mulf %29, %29 : vector<12x128xf32>
    %34 = arith.mulf %32, %33 : vector<12x128xf32>
    %cst_16 = arith.constant 3.000000e+00 : f32
    %35 = vector.broadcast %cst_16 : f32 to vector<12x128xf32>
    %36 = arith.mulf %35, %29 : vector<12x128xf32>
    %37 = arith.mulf %36, %34 : vector<12x128xf32>
    %38 = arith.subf %37, %30 : vector<12x128xf32>
    %39 = tpu.iota {dimensions = array<i32: 0>} : vector<12x128xi32>
    %40 = vector.shape_cast %13 : vector<1x128xf32> to vector<1x128xf32>
    %41 = vector.broadcast %40 : vector<1x128xf32> to vector<12x128xf32>
    %c8_i32 = arith.constant 8 : i32
    %42 = vector.broadcast %c8_i32 : i32 to vector<12x128xi32>
    %43 = arith.cmpi slt, %39, %42 : vector<12x128xi32>
    %44 = arith.select %43, %34, %38 : vector<12x128xi1>, vector<12x128xf32>
    %45 = vector.shape_cast %4 : vector<1x128xf32> to vector<1x128xf32>
    %46 = vector.broadcast %45 : vector<1x128xf32> to vector<12x128xf32>
    %47 = arith.select %43, %46, %41 : vector<12x128xi1>, vector<12x128xf32>
    %c4_i32 = arith.constant 4 : i32
    %48 = vector.broadcast %c4_i32 : i32 to vector<12x128xi32>
    %49 = arith.cmpi slt, %39, %48 : vector<12x128xi32>
    %50 = arith.select %49, %30, %44 : vector<12x128xi1>, vector<12x128xf32>
    %51 = vector.shape_cast %5 : vector<1x128xf32> to vector<1x128xf32>
    %52 = vector.broadcast %51 : vector<1x128xf32> to vector<12x128xf32>
    %53 = arith.select %49, %52, %47 : vector<12x128xi1>, vector<12x128xf32>
    %cst_17 = arith.constant 1.000000e+00 : f32
    %54 = vector.broadcast %cst_17 : f32 to vector<12x128xf32>
    %cst_18 = arith.constant 1.000000e+00 : f32
    %55 = vector.broadcast %cst_18 : f32 to vector<12x128xf32>
    %56 = arith.mulf %55, %22 : vector<12x128xf32>
    %c4_i32_19 = arith.constant 4 : i32
    %57 = vector.broadcast %c4_i32_19 : i32 to vector<12x128xi32>
    %58 = arith.cmpi sge, %39, %57 : vector<12x128xi32>
    %59 = arith.select %58, %56, %54 : vector<12x128xi1>, vector<12x128xf32>
    %60 = arith.mulf %56, %22 : vector<12x128xf32>
    %c8_i32_20 = arith.constant 8 : i32
    %61 = vector.broadcast %c8_i32_20 : i32 to vector<12x128xi32>
    %62 = arith.cmpi sge, %39, %61 : vector<12x128xi32>
    %63 = arith.select %62, %60, %59 : vector<12x128xi1>, vector<12x128xf32>
    %64 = arith.mulf %22, %22 : vector<12x128xf32>
    %65 = vector.broadcast %18 : vector<12x1xf32> to vector<12x128xf32>
    %66 = arith.mulf %64, %65 : vector<12x128xf32>
    %67 = vector.broadcast %17 : vector<12x1xf32> to vector<12x128xf32>
    %68 = arith.addf %67, %66 : vector<12x128xf32>
    %69 = arith.mulf %64, %68 : vector<12x128xf32>
    %70 = vector.broadcast %16 : vector<12x1xf32> to vector<12x128xf32>
    %71 = arith.addf %70, %69 : vector<12x128xf32>
    %72 = arith.mulf %64, %71 : vector<12x128xf32>
    %73 = vector.broadcast %15 : vector<12x1xf32> to vector<12x128xf32>
    %74 = arith.addf %73, %72 : vector<12x128xf32>
    %75 = arith.mulf %63, %74 : vector<12x128xf32>
    %cst_21 = arith.constant 1.000000e+00 : f32
    %76 = vector.broadcast %cst_21 : f32 to vector<12x128xf32>
    %77 = arith.cmpf olt, %22, %76 : vector<12x128xf32>
    %78 = arith.select %77, %75, %50 : vector<12x128xi1>, vector<12x128xf32>
    %c0_22 = arith.constant 0 : index
    %c0_23 = arith.constant 0 : index
    %79 = vector.load %arg2[%c0_22, %c0_23] : memref<12x1xf32, #tpu.memory_space<vmem>>, vector<12x1xf32>
    %80 = vector.broadcast %79 : vector<12x1xf32> to vector<12x128xf32>
    %81 = arith.mulf %80, %78 : vector<12x128xf32>
    %82 = arith.mulf %81, %53 : vector<12x128xf32>
    %c0_24 = arith.constant 0 : index
    %c0_25 = arith.constant 0 : index
    %83 = vector.load %arg6[%c0_24, %c0_25] : memref<12x128xf32, #tpu.memory_space<vmem>>, vector<12x128xf32>
    tpu.vector_store %arg6[%c0_24, %c0_25], %82 {strides = array<i32>} : memref<12x128xf32, #tpu.memory_space<vmem>>, vector<12x128xf32>,
    return
  }
  func.func @transform_0(%arg0: i32) -> (i32, i32) {
    %c0_i32 = arith.constant 0 : i32
    %c0_i32_0 = arith.constant 0 : i32
    %c0_i32_1 = arith.constant 0 : i32
    return %c0_i32, %c0_i32_0 : i32, i32
  }
  func.func @transform_1(%arg0: i32) -> (i32, i32) {
    %c0_i32 = arith.constant 0 : i32
    %c0_i32_0 = arith.constant 0 : i32
    %c0_i32_1 = arith.constant 0 : i32
    return %c0_i32, %c0_i32_0 : i32, i32
  }
  func.func @transform_2(%arg0: i32) -> (i32, i32) {
    %c0_i32 = arith.constant 0 : i32
    %c0_i32_0 = arith.constant 0 : i32
    %c0_i32_1 = arith.constant 0 : i32
    return %c0_i32, %c0_i32_0 : i32, i32
  }
  func.func @transform_3(%arg0: i32) -> (i32, i32) {
    %c0_i32 = arith.constant 0 : i32
    %c0_i32_0 = arith.constant 0 : i32
    return %c0_i32, %arg0 : i32, i32
  }
  func.func @transform_4(%arg0: i32) -> (i32, i32) {
    %c0_i32 = arith.constant 0 : i32
    %c0_i32_0 = arith.constant 0 : i32
    return %c0_i32, %arg0 : i32, i32
  }
  func.func @transform_5(%arg0: i32) -> (i32, i32) {
    %c0_i32 = arith.constant 0 : i32
    %c0_i32_0 = arith.constant 0 : i32
    return %c0_i32, %arg0 : i32, i32
  }
}

</mosaic_0001>

<bundles_post_ra>
// kernel: forward.1
= control target key start
LH: loop header
LB: loop body
LE: loop exit
PB: predicated region body
PF: predicated region fallthrough
CT: control target
= control target key end

     0   :  { %10 = vsyncpa [#allocation3], 0  ;;  %s1261_s18 = smov 0   ;;  %s1263_s19 = smov 0   ;;  %s1571_s0 = inlined_call_operand.hbm [shape: f32[12,1], index: 0, kind: input, shape index: {}]   ;;  %s1572_s1 = inlined_call_operand.vmem [shape: f32[12,1], index: 1, kind: input, shape index: {}]   ;;  %s1573_s2 = inlined_call_operand.vmem [shape: f32[12,5], index: 2, kind: input, shape index: {}]   ;;  %s1574_s3 = inlined_call_operand.vmem [shape: f32[1,384], index: 3, kind: input, shape index: {}]   ;;  %s1575_s4 = inlined_call_operand.vmem [shape: f32[1,384], index: 4, kind: input, shape index: {}]   ;;  %s1576_s5 = inlined_call_operand.vmem [shape: f32[12,384], index: 5, kind: output, shape index: {}]  }
   0x1   :  { %s1265_s20 = smov 0  }
   0x2 LB: > { %s1274_s21 = sadd.s32 4294967295, %s1215_s20   ;;  %s1276_s22 = sadd.s32 1, %s1215_s20   ;;  %s1215_s20 = sphi %s1265_s20, %s1590_s20   ;;  %s1211_s19 = sphi %s1263_s19, %s1589_s19   ;;  %s1207_s18 = sphi %s1261_s18, %s1588_s18  }
   0x3   : > { %s135_s23 = ssub.s32 %s1215_s20, %s1276_s22  ;;  %s138_s24 = sadd.s32 1, %s1211_s19 }
   0x4   : > { %p136_p0 = scmp.eq.s32.totalorder %s135_s23, 0  ;;  %p148_p1 = scmp.ne.s32.totalorder %s1211_s19, %s1207_s18 }
   0x5   : > { %p149_p2 = scmp.eq.s32.totalorder %s1274_s21, 2  ;;  %p1044_p3 = scmp.ge.s32.totalorder %s1215_s20, 1 }
   0x6   : > { %s1284_s25 = scalar_select %p136_p0, %s1211_s19, %s138_s24  }
   0x7   : > { %p1286_p4 = por %p149_p2, %p148_p1  ;;  %p162_p5 = scmp.lt.s32.totalorder %s1215_s20, 4 }
   0x8   : > { %p1577_p6 = scmp.eq.s32.totalorder %s1274_s21, 0  ;;  %s1217_s28 = smov [#allocation2]  }
   0x9   : > { %s1579_s26 = scalar_select %p1286_p4, 1, 0 }
   0xa   : > { %p1291_p7 = pnand %p1044_p3, %p162_p5  ;;  %s174_s29 = sshll.u32 %s1217_s28, 4  ;;  %s175_s29 = int_to_ptr.vmem [resolvable:$true] %s174_s29 }
   0xb   : > { %s1161_s8 = scalar_lea.hbm %s1571_s0, 256 }
   0xc   : > { %s1580_s27 = scalar_select %p1291_p7, 1, 0 }
   0xd   : > { %p1091_p8 = pneg %p1291_p7  ;;  %p1162_p10 = scmp.ne.s32.totalorder %s1571_s0, %s1161_s8 }
   0xe   : > { %p1168_p0 = scmp.lt.u32.totalorder %s1161_s8, %s1571_s0 }
   0xf   : > { %p1299_p9 = pnand %p1577_p6, %p1091_p8 }
  0x11   : > { %p1163_p11 = pneg %p1299_p9 }
  0x13   : > { %p1164_p12 = pnand %p1163_p11, %p1162_p10 }
  0x15   : > { %p1165_p13 = pneg %p1164_p12 }
  0x17   : > { %p1170_p1 = pnand %p1168_p0, %p1165_p13 }
  0x19   : > { %1173 = shalt.err (!%p1170_p1)
}
  0x1a   : > { %s1174_s13 = scalar_lea.vmem %s175_s29, 256  ;;  %p1182_p8 = scmp.lt.s32.totalorder %s175_s29, %s175_s29 }
  0x1b   : > { %p1175_p2 = scmp.ne.s32.totalorder %s175_s29, %s1174_s13  ;;  %p1183_p6 = scmp.lt.s32.totalorder %s1174_s13, %s1174_s13 }
  0x1d   : > { %p1177_p3 = pnand %p1175_p2, %p1163_p11  ;;  %p1184_p4 = por %p1183_p6, %p1182_p8 }
  0x1f   : > { %p1178_p5 = pneg %p1177_p3 }
  0x21   : > { %p1185_p7 = pnand %p1184_p4, %p1178_p5 }
  0x23   : > { %1188 = shalt.err (!%p1185_p7)
}
  0x24   : > { %s1218_s14 = smov 128   ;;  %s1219_s15 = smov 8  }
  0x25   : > { %1094 = dma.hbm_to_vmem [thread:$0]  (!%p1299_p9), %s1571_s0, 256, %s175_s29, [#allocation3], %s1218_s14, %s1218_s14, %s1219_s15  }
  0x26   : > { %p1582_p10 = scmp.ne.s32.totalorder %s1580_s27, 0 }
  0x27   : > { %p1583_p12 = scmp.eq.s32.totalorder (!%p1582_p10), %s1274_s21, 0 }
  0x28   : > { %208 = sbr.rel (%p1582_p10) target bundleno = 293 (0x125), region = 40 }
  0x2f   : > { %1202 = dma.done.wait (%p1583_p12), [#allocation3], 256   ;;  %p1584_p11 = pmov %p1583_p12 }
  0x30   : > { %v1220_v0 = vmov 4   ;;  %v1221_v1 = vmov 0   ;;  %v355_v2 = vld [vmem:[#allocation2 + $0x8] sm:$0xf]  ;;  %v352_v3 = vld [vmem:[%s1573_s2] sm:$0xff]  ;;  %v1222_v6 = vmov 3  }
  0x31   : > { %1204 = vsyncadd (%p1584_p11), [#allocation3], 4294967040  ;;  %1136 = vset.pattern.permute.xlu1 %v1220_v0  ;;  %1135 = vset.pattern.permute.xlu0 %v1221_v1  ;;  %v354_v4 = vld [vmem:[#allocation2] sm:$0xff]  ;;  %v353_v5 = vld [vmem:[%s1573_s2 + $0x8] sm:$0xf]  ;;  %p236_p4 = scmp.lt.s32.totalorder %s1274_s21, 2 }
  0x32   : > { %363 = vperm.xlu0 %1135, %v355_v2   ;;  %862 = vperm.xlu1 %1136, %v352_v3   ;;  %v1223_v7 = vmov 2   ;;  %v1224_v8 = vmov 1   ;;  %v912_v10 = vld [vmem:[%s1572_s1 + $0x8] sm:$0xf]  ;;  %v911_v14 = vld [vmem:[%s1572_s1] sm:$0xff]  ;;  %s233_s14 = sand.u32 1, %s1207_s18  }
  0x33   : > { %s1333_s28 = scalar_select %p236_p4, %s1274_s21, 2  ;;  %v1225_v19 = vmov 2102212464   ;;  %v1226_v21 = vmov 920167782  }
  0x34   : > { %v1227_v26 = vmov 1326507024   ;;  %v1228_v28 = vmov 683565275   ;;  %v1229_v30 = vmov 2475754826  }
  0x35   : > { %s241_s6 = scalar_lea.vmem %s1575_s4, %s1333_s28  ;;  %v1230_v33 = vmov 2131351028   ;;  %s238_s13 = scalar_lea.vmem %s1574_s3, %s1333_s28 }
  0x36   : > { %358 = vperm.xlu0 %1135, %v354_v4   ;;  %866 = vperm.xlu1 %1136, %v353_v5   ;;  %v1339_v9 = vld [vmem:[%s241_s6] sm:$0x1]  ;;  %s1049_s15 = sshll.u32 %s233_s14, 4  ;;  %p1587_p6 = scmp.ne.s32.totalorder %s1579_s26, 0 }
  0x37   : > { %v248_v11 = vand.u32 2139095040, %v1339_v9  ;;  %v245_v23 = vand.u32 2147483647, %v1339_v9  ;;  %vm247_vm13 = vcmp.lt.s32.totalorder %v1339_v9, 0  ;;  %s235_s18 = scalar_lea.vmem [#allocation4], %s1049_s15  ;;  %s1072_s16 = sshll.u32 (%p1587_p6), %s1274_s21, 3 }
  0x38   : > { %s937_s23 = scalar_lea.vmem (%p1587_p6), %s1576_s5, %s1072_s16 }
  0x39   : > { %v249_v12 = vshrl.u32 %v248_v11, 23  ;;  %v252_v38 = vand.u32 8388607, %v245_v23 }
  0x3a   : > { %1137 = vset.pattern.permute.xlu0 %v1222_v6  ;;  %1138 = vset.pattern.permute.xlu1 %v1222_v6 }
  0x3b   : > { %872 = vperm.xlu0 %1137, %v352_v3   ;;  %876 = vperm.xlu1 %1138, %v353_v5   ;;  %v1050_v13 = vadd.s32 4294967169, %v249_v12  ;;  %v253_v44 = vor.u32 8388608, %v252_v38 }
  0x3d   : > { %v255_v15 = vadd.s32 1, %v1050_v13  ;;  %v293_v50 = vshll.u32 %v253_v44, 8  ;;  %v242_v13 = vld [vmem:[%s238_s13] sm:$0x1] }
  0x3f   : > { %1140 = vset.pattern.permute.xlu0 %v1223_v7  ;;  %1139 = vset.pattern.permute.xlu1 %v1221_v1  ;;  %vm256_vm0 = vcmp.gt.s32.totalorder %v255_v15, 0 }
  0x40   : > { %884 = vperm.xlu0 %1140, %v352_v3   ;;  %797 = vperm.xlu1 %1139, %v353_v5   ;;  %v257_v16 = vsel %vm256_vm0, %v255_v15, 0  ;;  %v1395_v15 = vmul.f32 0.125, %v242_v13 }
  0x41   : > { %v259_v17 = vand.u32 31, %v257_v16  ;;  %v258_v24 = vshrl.u32 %v257_v16, 5 }
  0x43   : > { %v260_v18 = vsub.s32 32, %v259_v17  ;;  %v271_v20 = vshll.u32 %v1225_v19, %v259_v17  ;;  %v274_v25 = vshll.u32 %v1226_v21, %v259_v17  ;;  %v262_v29 = vshll.u32 %v1228_v28, %v259_v17 }
  0x44   : > { %1143 = vset.pattern.permute.xlu0 %v1224_v8  ;;  %1141 = vset.pattern.permute.xlu1 %v1223_v7  ;;  %v265_v31 = vshll.u32 %v1229_v30, %v259_v17  ;;  %v268_v35 = vshll.u32 %v1230_v33, %v259_v17  ;;  %vm280_vm1 = vcmp.lt.s32.totalorder %v258_v24, 4  ;;  %vm277_vm2 = vcmp.lt.s32.totalorder %v258_v24, 1 }
  0x45   : > { %896 = vperm.xlu0 %1143, %v352_v3   ;;  %888 = vperm.xlu1 %1141, %v353_v5   ;;  %v272_v22 = vshrl.u32 %v1226_v21, %v260_v18  ;;  %v275_v27 = vshrl.u32 %v1227_v26, %v260_v18  ;;  %v263_v32 = vshrl.u32 %v1229_v30, %v260_v18  ;;  %vm279_vm3 = vcmp.lt.s32.totalorder %v258_v24, 3 }
  0x46   : > { %v266_v34 = vshrl.u32 %v1230_v33, %v260_v18  ;;  %v269_v36 = vshrl.u32 %v1225_v19, %v260_v18  ;;  %vm278_vm4 = vcmp.lt.s32.totalorder %v258_v24, 2  ;;  %v261_v55 = vshrl.u32 %v1228_v28, %v260_v18 }
  0x47   : > { %v273_v37 = vor.u32 %v272_v22, %v271_v20  ;;  %v276_v39 = vor.u32 %v275_v27, %v274_v25  ;;  %v264_v40 = vor.u32 %v263_v32, %v262_v29 }
  0x48   : > { %v267_v41 = vor.u32 %v266_v34, %v265_v31  ;;  %v270_v42 = vor.u32 %v269_v36, %v268_v35 }
  0x49   : > { %1142 = vset.pattern.permute.xlu1 %v1221_v1  ;;  %1146 = vset.pattern.permute.xlu0 %v1221_v1  ;;  %v286_v43 = vsel %vm280_vm1, %v273_v37, 920167782  ;;  %v290_v45 = vsel %vm280_vm1, %v276_v39, 1326507024  ;;  %v281_v59 = vsel %vm277_vm2, %v261_v55, %v264_v40 }
  0x4a   : > { %792 = vperm.xlu1 %1142, %v352_v3   ;;  %920 = vperm.xlu0 %1146, %v912_v10   ;;  %v285_v46 = vsel %vm277_vm2, %v264_v40, %v267_v41  ;;  %v287_v47 = vsel %vm279_vm3, %v270_v42, %v286_v43  ;;  %v289_v48 = vsel %vm277_vm2, %v267_v41, %v270_v42  ;;  %v282_v58 = vsel %vm280_vm1, %v270_v42, 2102212464 }
  0x4b   : > { %v291_v49 = vsel %vm279_vm3, %v273_v37, %v290_v45  ;;  %v288_v51 = vsel %vm278_vm4, %v285_v46, %v287_v47  ;;  %v283_v60 = vsel %vm279_vm3, %v267_v41, %v282_v58  ;;  %vm1451_vm2 = vcmp.le.f32.partialorder %v245_v23, 0.7853982 }
  0x4c   : > { %v292_v52 = vsel %vm278_vm4, %v289_v48, %v291_v49  ;;  %v1369_v53 = vmul.u32.u64.low %v293_v50, %v288_v51  ;;  %v1370_v54 = vmul.u32.u64.high %v293_v50, %v288_v51, %v1369_v53  ;;  %v284_v61 = vsel %vm278_vm4, %v281_v59, %v283_v60 }
  0x4d   : > { %v1373_v56 = vmul.u32.u64.low %v293_v50, %v292_v52  ;;  %v1374_v57 = vmul.u32.u64.high %v293_v50, %v292_v52, %v1373_v56  ;;  %v300_v63 = vmul.u32 %v293_v50, %v284_v61 }
  0x4e   : > { %1144 = vset.pattern.permute.xlu1 %v1224_v8  ;;  %v303_v62 = vadd.s32 1, %v1370_v54  ;;  %v367_v8 = vlaneseq }
  0x4f   : > { %900 = vperm.xlu1 %1144, %v353_v5   ;;  %vm302_vm5 = vc.u32 %v1374_v57, %v1369_v53  ;;  %v301_v24 = vadd.s32 %v1369_v53, %v1374_v57 }
  0x50   : > { %v304_v0 = vsel %vm302_vm5, %v303_v62, %v1370_v54  ;;  %v1390_v11 = vshrl.u32 %v367_v8, 7 }
  0x53   : > { %1145 = vset.pattern.permute.xlu1 %v1221_v1  ;;  %v305_v1 = vadd.s32 %v304_v0, %v300_v63 }
  0x54   : > { %915 = vperm.xlu1 %1145, %v911_v14   ;;  %v1393_v14 = vsub.s32 0, %v1390_v11 }
  0x55   : > { %v306_v2 = vadd.s32 536870912, %v305_v1 }
  0x56   : > { %v370_v17 = vrot.slane %v1395_v15, %v1393_v14 }
  0x57   : > { %v1383_v3 = vshrl.u32 %v306_v2, 30 }
  0x59   : > { %v308_v4 = vshll.u32 %v1383_v3, 30 }
  0x5b   : > { %v309_v5 = vsub.s32 %v305_v1, %v308_v4 }
  0x5d   : > { %v311_v6 = vsub.s32 0, %v309_v5 }
  0x5f   : > { %v1051_v7 = vmin.u32 %v311_v6, %v309_v5 }
  0x61   : > { %v313_v10 = vclz %v1051_v7 }
  0x63   : > { %v1052_v12 = vadd.s32 4294967294, %v313_v10 }
  0x65   : > { %vm1053_vm6 = vcmp.lt.s32.totalorder %v1052_v12, 0 }
  0x66   : > { %v316_v16 = vsel %vm1053_vm6, 0, %v1052_v12 }
  0x67   : > { %v321_v18 = vsub.s32 4294967266, %v316_v16  ;;  %v317_v25 = vsub.s32 32, %v316_v16  ;;  %v318_v35 = vshll.u32 %v309_v5, %v316_v16 }
  0x69   : > { %v322_v27 = vadd.s32 127, %v321_v18  ;;  %v319_v36 = vshrl.u32 %v301_v24, %v317_v25 }
  0x6b   : > { %v323_v37 = vshll.u32 %v322_v27, 23  ;;  %v320_v41 = vor.u32 %v319_v36, %v318_v35 }
  0x6d   : > { %v324_v42 = vor.u32 4788187, %v323_v37  ;;  %v327_v48 = vcvt.s32.f32 %v320_v41 }
  0x6f   : > { %v325_v47 = vand.u32 2147483647, %v324_v42 }
  0x71   : > { %v328_v41 = vmul.f32 %v327_v48, %v325_v47 }
  0xb1   : > { %v364_v20 = vpop.permute.xlu0 %363 }
  0xb2   : > { %v1399_v22 = vmul.f32 %v370_v17, %v364_v20 }
  0xb4   : > { %v481_v29 = vand.u32 2139095040, %v1399_v22  ;;  %v478_v43 = vand.u32 2147483647, %v1399_v22 }
  0xb5   : > { %v359_v31 = vpop.permute.xlu0 %358 }
  0xb6   : > { %v482_v32 = vshrl.u32 %v481_v29, 23  ;;  %v1403_v34 = vmul.f32 %v370_v17, %v359_v31  ;;  %v485_v49 = vand.u32 8388607, %v478_v43 }
  0xb8   : > { %v1059_v38 = vadd.s32 4294967169, %v482_v32  ;;  %v377_v39 = vand.u32 2139095040, %v1403_v34  ;;  %v486_v63 = vor.u32 8388608, %v485_v49  ;;  %v374_v37 = vand.u32 2147483647, %v1403_v34 }
  0xba   : > { %v488_v40 = vadd.s32 1, %v1059_v38  ;;  %v378_v45 = vshrl.u32 %v377_v39, 23  ;;  %v526_v20 = vshll.u32 %v486_v63, 8 }
  0xbc   : > { %vm489_vm7 = vcmp.gt.s32.totalorder %v488_v40, 0  ;;  %v1055_v54 = vadd.s32 4294967169, %v378_v45  ;;  %v381_v45 = vand.u32 8388607, %v374_v37 }
  0xbd   : > { %v490_v44 = vsel %vm489_vm7, %v488_v40, 0 }
  0xbe   : > { %v492_v46 = vand.u32 31, %v490_v44  ;;  %v491_v51 = vshrl.u32 %v490_v44, 5  ;;  %v384_v10 = vadd.s32 1, %v1055_v54 }
  0xc0   : > { %v493_v50 = vsub.s32 32, %v492_v46  ;;  %v495_v52 = vshll.u32 %v1228_v28, %v492_v46  ;;  %v498_v53 = vshll.u32 %v1229_v30, %v492_v46  ;;  %v501_v57 = vshll.u32 %v1230_v33, %v492_v46 }
  0xc1   : > { %v504_v59 = vshll.u32 %v1225_v19, %v492_v46  ;;  %v507_v61 = vshll.u32 %v1226_v21, %v492_v46  ;;  %vm510_vm8 = vcmp.lt.s32.totalorder %v491_v51, 1  ;;  %vm513_vm9 = vcmp.lt.s32.totalorder %v491_v51, 4 }
  0xc2   : > { %v496_v55 = vshrl.u32 %v1229_v30, %v493_v50  ;;  %v499_v56 = vshrl.u32 %v1230_v33, %v493_v50  ;;  %v502_v58 = vshrl.u32 %v1225_v19, %v493_v50  ;;  %v505_v60 = vshrl.u32 %v1226_v21, %v493_v50 }
  0xc3   : > { %v508_v62 = vshrl.u32 %v1227_v26, %v493_v50  ;;  %v494_v12 = vshrl.u32 %v1228_v28, %v493_v50  ;;  %vm512_vm10 = vcmp.lt.s32.totalorder %v491_v51, 3  ;;  %vm511_vm11 = vcmp.lt.s32.totalorder %v491_v51, 2 }
  0xc4   : > { %v497_v0 = vor.u32 %v496_v55, %v495_v52  ;;  %v500_v1 = vor.u32 %v499_v56, %v498_v53  ;;  %v503_v2 = vor.u32 %v502_v58, %v501_v57  ;;  %v506_v4 = vor.u32 %v505_v60, %v504_v59 }
  0xc5   : > { %v509_v5 = vor.u32 %v508_v62, %v507_v61  ;;  %vm385_vm12 = vcmp.gt.s32.totalorder %v384_v10, 0  ;;  %v329_v60 = vxor.u32 2147483648, %v328_v41 }
  0xc6   : > { %v515_v6 = vsel %vm513_vm9, %v503_v2, 2102212464  ;;  %v518_v7 = vsel %vm510_vm8, %v497_v0, %v500_v1  ;;  %v522_v8 = vsel %vm510_vm8, %v500_v1, %v503_v2  ;;  %v519_v13 = vsel %vm513_vm9, %v506_v4, 920167782 }
  0xc7   : > { %v523_v16 = vsel %vm513_vm9, %v509_v5, 1326507024  ;;  %v520_v17 = vsel %vm512_vm10, %v503_v2, %v519_v13  ;;  %v514_v24 = vsel %vm510_vm8, %v494_v12, %v497_v0  ;;  %v516_v25 = vsel %vm512_vm10, %v500_v1, %v515_v6 }
  0xc8   : > { %v524_v18 = vsel %vm512_vm10, %v506_v4, %v523_v16  ;;  %v521_v27 = vsel %vm511_vm11, %v518_v7, %v520_v17  ;;  %v517_v38 = vsel %vm511_vm11, %v514_v24, %v516_v25  ;;  %v386_v39 = vsel %vm385_vm12, %v384_v10, 0 }
  0xc9   : > { %v525_v29 = vsel %vm511_vm11, %v522_v8, %v524_v18  ;;  %v1423_v35 = vmul.u32.u64.low %v526_v20, %v521_v27  ;;  %v1424_v36 = vmul.u32.u64.high %v526_v20, %v521_v27, %v1423_v35  ;;  %v388_v40 = vand.u32 31, %v386_v39 }
  0xca   : > { %v1420_v31 = vmul.u32.u64.low %v526_v20, %v525_v29  ;;  %v1421_v32 = vmul.u32.u64.high %v526_v20, %v525_v29, %v1420_v31  ;;  %v533_v44 = vmul.u32 %v526_v20, %v517_v38  ;;  %v387_v46 = vshrl.u32 %v386_v39, 5 }
  0xcb   : > { %v536_v42 = vadd.s32 1, %v1424_v36  ;;  %v389_v49 = vsub.s32 32, %v388_v40  ;;  %v391_v51 = vshll.u32 %v1228_v28, %v388_v40  ;;  %v394_v52 = vshll.u32 %v1229_v30, %v388_v40 }
  0xcc   : > { %vm535_vm14 = vc.u32 %v1421_v32, %v1423_v35  ;;  %v397_v53 = vshll.u32 %v1230_v33, %v388_v40  ;;  %v400_v55 = vshll.u32 %v1225_v19, %v388_v40  ;;  %v403_v58 = vshll.u32 %v1226_v21, %v388_v40 }
  0xcd   : > { %v537_v50 = vsel %vm535_vm14, %v536_v42, %v1424_v36  ;;  %v392_v48 = vshrl.u32 %v1229_v30, %v389_v49  ;;  %v395_v54 = vshrl.u32 %v1230_v33, %v389_v49  ;;  %v398_v56 = vshrl.u32 %v1225_v19, %v389_v49 }
  0xce   : > { %v538_v47 = vadd.s32 %v537_v50, %v533_v44  ;;  %v401_v57 = vshrl.u32 %v1226_v21, %v389_v49  ;;  %v404_v59 = vshrl.u32 %v1227_v26, %v389_v49  ;;  %v382_v0 = vor.u32 8388608, %v381_v45 }
  0xcf   : > { %v393_v62 = vor.u32 %v392_v48, %v391_v51  ;;  %v396_v63 = vor.u32 %v395_v54, %v394_v52  ;;  %v399_v1 = vor.u32 %v398_v56, %v397_v53  ;;  %vm406_vm15 = vcmp.lt.s32.totalorder %v387_v46, 1 }
  0xd0   : > { %v539_v61 = vadd.s32 536870912, %v538_v47  ;;  %v402_v2 = vor.u32 %v401_v57, %v400_v55  ;;  %v405_v30 = vor.u32 %v404_v59, %v403_v58  ;;  %vm408_vm0 = vcmp.lt.s32.totalorder %v387_v46, 3  ;;  %v1488_v55 = vpop.permute.xlu1 %862 }
  0xd1   : > { %vm409_vm1 = vcmp.lt.s32.totalorder %v387_v46, 4  ;;  %v414_v19 = vsel %vm406_vm15, %v393_v62, %v396_v63  ;;  %v418_v21 = vsel %vm406_vm15, %v396_v63, %v399_v1  ;;  %v330_v6 = vsel %vm247_vm13, %v329_v60, %v328_v41 }
  0xd2   : > { %v1445_v4 = vshrl.u32 %v539_v61, 30  ;;  %v415_v33 = vsel %vm409_vm1, %v402_v2, 920167782  ;;  %v419_v5 = vsel %vm409_vm1, %v405_v30, 1326507024  ;;  %vm407_vm3 = vcmp.lt.s32.totalorder %v387_v46, 2 }
  0xd3   : > { %v416_v8 = vsel %vm408_vm0, %v399_v1, %v415_v33  ;;  %v411_v10 = vsel %vm409_vm1, %v399_v1, 2102212464  ;;  %v420_v12 = vsel %vm408_vm0, %v402_v2, %v419_v5  ;;  %v422_v13 = vshll.u32 %v382_v0, 8 }
  0xd4   : > { %v541_v7 = vshll.u32 %v1445_v4, 30  ;;  %v390_v17 = vshrl.u32 %v1228_v28, %v389_v49  ;;  %v417_v23 = vsel %vm407_vm3, %v414_v19, %v416_v8  ;;  %v421_v18 = vsel %vm407_vm3, %v418_v21, %v420_v12  ;;  %v867_v2 = vpop.permute.xlu1 %866 }
  0xd5   : > { %v1463_v20 = vmul.u32.u64.low %v422_v13, %v421_v18  ;;  %v1464_v24 = vmul.u32.u64.high %v422_v13, %v421_v18, %v1463_v20  ;;  %v412_v29 = vsel %vm408_vm0, %v396_v63, %v411_v10  ;;  %v333_v31 = vsel %vm1451_vm2, %v1339_v9, %v330_v6 }
  0xd6   : > { %v542_v16 = vsub.s32 %v538_v47, %v541_v7  ;;  %v410_v27 = vsel %vm406_vm15, %v390_v17, %v393_v62  ;;  %v1471_v36 = vmul.u32.u64.low %v422_v13, %v417_v23  ;;  %v1472_v38 = vmul.u32.u64.high %v422_v13, %v417_v23, %v1471_v36 }
  0xd7   : > { %v413_v39 = vsel %vm407_vm3, %v410_v27, %v412_v29  ;;  %1147 = vsinq.f32 %v333_v31  ;;  %v331_v41 = vsub.s32 4, %v1383_v3  ;;  %v534_v52 = vadd.s32 %v1423_v35, %v1421_v32 }
  0xd8   : > { %v544_v25 = vsub.s32 0, %v542_v16  ;;  %vm431_vm4 = vc.u32 %v1464_v24, %v1471_v36  ;;  %1149 = vcosq.f32 %v333_v31  ;;  %v432_v42 = vadd.s32 1, %v1472_v38 }
  0xd9   : > { %v429_v45 = vmul.u32 %v422_v13, %v413_v39  ;;  %v332_v46 = vsel %vm247_vm13, %v331_v41, %v1383_v3  ;;  %1151 = vrcp.f32 %v1395_v15  ;;  %v564_v26 = vsub.s32 4, %v1445_v4  ;;  %v877_v13 = vpop.permute.xlu1 %876 }
  0xda   : > { %v1060_v28 = vmin.u32 %v544_v25, %v542_v16  ;;  %v433_v49 = vsel %vm431_vm4, %v432_v42, %v1472_v38  ;;  %v334_v54 = vsel %vm1451_vm2, 0, %v332_v46  ;;  %vm480_vm9 = vcmp.lt.s32.totalorder %v1399_v22, 0 }
  0xdb   : > { %v434_v50 = vadd.s32 %v433_v49, %v429_v45  ;;  %v338_v32 = vand.u32 3, %v334_v54  ;;  %vm479_vm10 = vcmp.le.f32.partialorder %v478_v43, 0.7853982  ;;  %v565_v17 = vsel %vm480_vm9, %v564_v26, %v1445_v4 }
  0xdc   : > { %v546_v40 = vclz %v1060_v28  ;;  %v1501_v15 = vmul.f32 %v1399_v22, %v1399_v22  ;;  %vm337_vm11 = vweird.f32 %v1339_v9  ;;  %v567_v25 = vsel %vm479_vm10, 0, %v565_v17 }
  0xdd   : > { %v435_v48 = vadd.s32 536870912, %v434_v50  ;;  %vm340_vm6 = vcmp.eq.s32.totalorder %v338_v32, 0  ;;  %vm343_vm7 = vcmp.eq.s32.totalorder %v338_v32, 2  ;;  %vm339_vm8 = vcmp.lt.s32.totalorder %v338_v32, 2  ;;  %v798_v29 = vpop.permute.xlu1 %797 }
  0xde   : > { %v1061_v44 = vadd.s32 4294967294, %v546_v40  ;;  %v430_v43 = vadd.s32 %v1471_v36, %v1464_v24  ;;  %v870_v28 = vmul.f32 %v867_v2, %v1501_v15  ;;  %v571_v40 = vadd.s32 3, %v567_v25 }
  0xdf   : > { %v1490_v59 = vshrl.u32 %v435_v48, 30  ;;  %v1513_v49 = vmul.f32 %v1403_v34, %v1403_v34  ;;  %v778_v36 = vand.u32 3, %v567_v25  ;;  %vm570_vm13 = vweird.f32 %v1399_v22 }
  0xe0   : > { %vm1062_vm5 = vcmp.lt.s32.totalorder %v1061_v44, 0  ;;  %v880_v45 = vadd.f32 %v877_v13, %v870_v28  ;;  %vm376_vm4 = vcmp.lt.s32.totalorder %v1403_v34, 0 }
  0xe1   : > { %v549_v51 = vsel %vm1062_vm5, 0, %v1061_v44  ;;  %v1148_v60 = vpop.eup %1147  ;;  %v437_v62 = vshll.u32 %v1490_v59, 30  ;;  %vm779_vm14 = vcmp.lt.s32.totalorder %v778_v36, 2  ;;  %vm783_vm15 = vcmp.eq.s32.totalorder %v778_v36, 2 }
  0xe2   : > { %v550_v53 = vsub.s32 32, %v549_v51  ;;  %v554_v47 = vsub.s32 4294967266, %v549_v51  ;;  %v551_v56 = vshll.u32 %v542_v16, %v549_v51  ;;  %v1150_v63 = vpop.eup %1149  ;;  %v341_v1 = vxor.u32 2147483648, %v1148_v60 }
  0xe3   : > { %v438_v0 = vsub.s32 %v434_v50, %v437_v62  ;;  %v344_v21 = vxor.u32 2147483648, %v1150_v63  ;;  %v1152_v39 = vpop.eup %1151  ;;  %v572_v51 = vand.u32 3, %v571_v40  ;;  %vm780_vm2 = vcmp.eq.s32.totalorder %v778_v36, 0 }
  0xe4   : > { %v552_v57 = vshrl.u32 %v534_v52, %v550_v53  ;;  %v555_v58 = vadd.s32 127, %v554_v47  ;;  %v342_v10 = vsel %vm340_vm6, %v1150_v63, %v341_v1  ;;  %v1516_v46 = vrot.slane %v1152_v39, %v1393_v14  ;;  %v889_v52 = vpop.permute.xlu1 %888  ;;  %v873_v47 = vpop.permute.xlu0 %872 }
  0xe5   : > { %v440_v33 = vsub.s32 0, %v438_v0  ;;  %v345_v12 = vsel %vm343_vm7, %v344_v21, %v1148_v60  ;;  %vm577_vm0 = vcmp.eq.s32.totalorder %v572_v51, 2  ;;  %vm574_vm1 = vcmp.eq.s32.totalorder %v572_v51, 0 }
  0xe6   : > { %v553_v61 = vor.u32 %v552_v57, %v551_v56  ;;  %v556_v3 = vshll.u32 %v555_v58, 23  ;;  %v346_v20 = vsel %vm339_vm8, %v342_v10, %v345_v12  ;;  %v869_v56 = vmul.f32 %v1488_v55, %v1513_v49 }
  0xe7   : > { %v1056_v6 = vmin.u32 %v440_v33, %v438_v0  ;;  %v1507_v38 = vsel %vm337_vm11, nan, %v346_v20  ;;  %v882_v57 = vmul.f32 %v880_v45, %v1501_v15  ;;  %v807_v62 = vmul.f32 %v1516_v46, %v798_v29 }
  0xe8   : > { %v557_v35 = vor.u32 4788187, %v556_v3  ;;  %v560_v19 = vcvt.s32.f32 %v553_v61  ;;  %v348_v44 = vmul.f32 3.0, %v1507_v38  ;;  %v1524_v32 = vpop.permute.xlu1 %792  ;;  %vm573_vm3 = vcmp.lt.s32.totalorder %v572_v51, 2  ;;  %v885_v33 = vpop.permute.xlu0 %884 }
  0xe9   : > { %v442_v8 = vclz %v1056_v6  ;;  %v892_v26 = vadd.f32 %v889_v52, %v882_v57  ;;  %vm375_vm5 = vcmp.le.f32.partialorder %v374_v37, 0.7853982  ;;  %v879_v10 = vadd.f32 %v873_v47, %v869_v56 }
  0xea   : > { %v558_v30 = vand.u32 2147483647, %v557_v35  ;;  %v349_v48 = vmul.f32 %v348_v44, %v1507_v38  ;;  %v815_v17 = vmul.f32 %v807_v62, %v807_v62  ;;  %v819_v29 = vmul.f32 3.0, %v807_v62 }
  0xeb   : > { %v1057_v23 = vadd.s32 4294967294, %v442_v8  ;;  %v894_v37 = vmul.f32 %v892_v26, %v1501_v15  ;;  %vm908_vm6 = vcmp.lt.f32.partialorder %v1399_v22, 1.0 }
  0xec   : > { %v561_v5 = vmul.f32 %v560_v19, %v558_v30 }
  0xed   : > { %vm1058_vm12 = vcmp.lt.s32.totalorder %v1057_v23, 0 }
  0xee   : > { %v562_v7 = vxor.u32 2147483648, %v561_v5  ;;  %v445_v27 = vsel %vm1058_vm12, 0, %v1057_v23  ;;  %v901_v23 = vpop.permute.xlu1 %900 }
  0xef   : > { %v446_v4 = vsub.s32 32, %v445_v27  ;;  %v450_v31 = vsub.s32 4294967266, %v445_v27  ;;  %v447_v41 = vshll.u32 %v438_v0, %v445_v27  ;;  %v460_v0 = vsub.s32 4, %v1490_v59 }
  0xf0   : > { %v563_v16 = vsel %vm480_vm9, %v562_v7, %v561_v5 }
  0xf1   : > { %v566_v18 = vsel %vm479_vm10, %v1399_v22, %v563_v16  ;;  %v448_v9 = vshrl.u32 %v430_v43, %v446_v4  ;;  %v451_v42 = vadd.s32 127, %v450_v31  ;;  %v461_v8 = vsel %vm376_vm4, %v460_v0, %v1490_v59  ;;  %v897_v43 = vpop.permute.xlu0 %896 }
  0xf2   : > { %1153 = vcosq.f32 %v566_v18  ;;  %v463_v25 = vsel %vm375_vm5, 0, %v461_v8  ;;  %v881_v59 = vmul.f32 %v879_v10, %v1513_v49  ;;  %v904_v4 = vadd.f32 %v901_v23, %v894_v37 }
  0xf3   : > { %1155 = vsinq.f32 %v566_v18  ;;  %v449_v50 = vor.u32 %v448_v9, %v447_v41  ;;  %v452_v24 = vshll.u32 %v451_v42, 23  ;;  %v1054_v18 = vadd.f32 -1.0, %v349_v48 }
  0xf4   : > { %v467_v31 = vadd.s32 3, %v463_v25  ;;  %v891_v41 = vadd.f32 %v885_v33, %v881_v59  ;;  %v906_v9 = vmul.f32 %v904_v4, %v1501_v15 }
  0xf5   : > { %v453_v53 = vor.u32 4788187, %v452_v24  ;;  %v456_v60 = vcvt.s32.f32 %v449_v50  ;;  %v351_v28 = vmul.f32 0.5, %v1054_v18  ;;  %v921_v42 = vpop.permute.xlu0 %920  ;;  %v675_v50 = vand.u32 3, %v463_v25 }
  0xf6   : > { %v468_v45 = vand.u32 3, %v467_v31  ;;  %v893_v47 = vmul.f32 %v891_v41, %v1513_v49  ;;  %v806_v49 = vmul.f32 %v1516_v46, %v1524_v32  ;;  %v916_v46 = vpop.permute.xlu1 %915 }
  0xf7   : > { %v454_v58 = vand.u32 2147483647, %v453_v53  ;;  %v831_v24 = vrot.slane %v351_v28, %v1393_v14  ;;  %vm680_vm8 = vcmp.eq.s32.totalorder %v675_v50, 2  ;;  %vm677_vm10 = vcmp.eq.s32.totalorder %v675_v50, 0 }
  0xf8   : > { %vm473_vm7 = vcmp.eq.s32.totalorder %v468_v45, 2  ;;  %vm470_vm9 = vcmp.eq.s32.totalorder %v468_v45, 0  ;;  %vm469_vm11 = vcmp.lt.s32.totalorder %v468_v45, 2  ;;  %vm676_vm12 = vcmp.lt.s32.totalorder %v675_v50, 2 }
  0xf9   : > { %v457_v35 = vmul.f32 %v456_v60, %v454_v58 }
  0xfb   : > { %v458_v19 = vxor.u32 2147483648, %v457_v35 }
  0xfc   : > { %v1154_v54 = vpop.eup %1153 }
  0xfd   : > { %v1156_v61 = vpop.eup %1155  ;;  %v578_v3 = vxor.u32 2147483648, %v1154_v54  ;;  %v459_v7 = vsel %vm376_vm4, %v458_v19, %v457_v35 }
  0xfe   : > { %v575_v63 = vxor.u32 2147483648, %v1156_v61  ;;  %v462_v13 = vsel %vm375_vm5, %v1403_v34, %v459_v7 }
  0xff   : > { %v579_v1 = vsel %vm577_vm0, %v578_v3, %v1156_v61  ;;  %v785_v55 = vsel %vm783_vm15, %v578_v3, %v1156_v61  ;;  %1157 = vcosq.f32 %v462_v13  ;;  %vm845_vm15 = vcmp.lt.s32.totalorder %v1390_v11, 4 }
 0x100   : > { %v576_v2 = vsel %vm574_vm1, %v1154_v54, %v575_v63  ;;  %v782_v30 = vsel %vm780_vm2, %v1154_v54, %v575_v63  ;;  %1159 = vsinq.f32 %v462_v13  ;;  %v903_v63 = vadd.f32 %v897_v43, %v893_v47 }
 0x101   : > { %v580_v21 = vsel %vm573_vm3, %v576_v2, %v579_v1  ;;  %v786_v5 = vsel %vm779_vm14, %v782_v30, %v785_v55  ;;  %vm851_vm14 = vcmp.ge.s32.totalorder %v1390_v11, 4  ;;  %v814_v1 = vmul.f32 %v806_v49, %v806_v49 }
 0x102   : > { %v787_v6 = vsel %vm570_vm13, nan, %v786_v5  ;;  %v581_v16 = vsel %vm570_vm13, nan, %v580_v21  ;;  %vm466_vm13 = vweird.f32 %v1403_v34  ;;  %v841_v55 = vrot.slane %v1507_v38, %v1393_v14 }
 0x103   : > { %v811_v12 = vmul.f32 %v787_v6, %v1399_v22  ;;  %v809_v39 = vmul.f32 %v807_v62, %v581_v16  ;;  %v853_v2 = vsel %vm851_vm14, %v1403_v34, 1.0  ;;  %vm907_vm0 = vcmp.lt.f32.partialorder %v1403_v34, 1.0 }
 0x104   : > { %v905_v33 = vmul.f32 %v903_v63, %v853_v2  ;;  %v849_v21 = vsel %vm845_vm15, 1.0, %v841_v55 }
 0x105   : > { %v813_v20 = vsub.f32 %v581_v16, %v811_v12 }
 0x107   : > { %v817_v27 = vmul.f32 %v815_v17, %v813_v20 }
 0x109   : > { %v821_v40 = vmul.f32 %v819_v29, %v817_v27  ;;  %v1158_v51 = vpop.eup %1157 }
 0x10a   : > { %v1160_v53 = vpop.eup %1159  ;;  %v474_v48 = vxor.u32 2147483648, %v1158_v51 }
 0x10b   : > { %v823_v44 = vsub.f32 %v821_v40, %v809_v39  ;;  %v471_v54 = vxor.u32 2147483648, %v1160_v53 }
 0x10c   : > { %v475_v56 = vsel %vm473_vm7, %v474_v48, %v1160_v53  ;;  %v682_v57 = vsel %vm680_vm8, %v474_v48, %v1160_v53 }
 0x10d   : > { %v910_v36 = vsel %vm908_vm6, %v906_v9, %v823_v44  ;;  %v472_v58 = vsel %vm470_vm9, %v1158_v51, %v471_v54  ;;  %v679_v60 = vsel %vm677_vm10, %v1158_v51, %v471_v54 }
 0x10e   : > { %v924_v52 = vmul.f32 %v921_v42, %v910_v36  ;;  %v476_v22 = vsel %vm469_vm11, %v472_v58, %v475_v56  ;;  %v683_v61 = vsel %vm676_vm12, %v679_v60, %v682_v57 }
 0x10f   : > { %v684_v3 = vsel %vm466_vm13, nan, %v683_v61  ;;  %v477_v35 = vsel %vm466_vm13, nan, %v476_v22 }
 0x110   : > { %v926_v15 = vmul.f32 %v924_v52, %v831_v24  ;;  %v810_v62 = vmul.f32 %v684_v3, %v1403_v34  ;;  %v808_v30 = vmul.f32 %v806_v49, %v477_v35 }
 0x112   : > { %928 = vst [vmem:[%s235_s18 + $0x8] sm:$0xf] %v926_v15  ;;  %v812_v0 = vsub.f32 %v477_v35, %v810_v62 }
 0x114   : > { %v816_v19 = vmul.f32 %v814_v1, %v812_v0 }
 0x116   : > { %v847_v32 = vsel %vm845_vm15, %v808_v30, %v816_v19  ;;  %935 = sbr.rel (!%p1587_p6) target bundleno = 293 (0x125), region = 48 }
 0x117   : > { %v909_v5 = vsel %vm907_vm0, %v905_v33, %v847_v32 }
 0x118   : > { %v923_v26 = vmul.f32 %v916_v46, %v909_v5 }
 0x119   : > { %v969_v14 = vld [vmem:[%s235_s18 + $0x8] sm:$0xff] (%p1587_p6) }
 0x11a   : > { %v925_v6 = vmul.f32 %v923_v26, %v849_v21  ;;  %970 = vst [vmem:[%s937_s23 + $0x18] sm:$0xff] (%p1587_p6), %v969_v14 }
 0x11c   : > { %927 = vst [vmem:[%s235_s18] sm:$0xff] %v925_v6 }
 0x123   : > { %v967_v11 = vld [vmem:[%s235_s18] sm:$0xff] }
 0x124   : > { %968 = vst [vmem:[%s937_s23] sm:$0xff] %v967_v11 }
 0x125 PF: > { %p13_p7 = scmp.ge.s32.totalorder %s1276_s22, 5   ;;  %s1588_s18 = smov %s1211_s19 }
 0x126   : > { %s1589_s19 = smov %s1284_s25  ;;  %s1590_s20 = smov %s1276_s22 }
 0x127   :  { %15 = sbr.rel (!%p13_p7) target bundleno = 2 (0x2), region = 116 }
 0x12e   :  { %986 = vsyncpa [#allocation3], 1 }
 0x12f   :  { %988 = vsyncpa [#allocation3 + $0x1], 1 }

</bundles_post_ra>
